<compile_context>
chip_gen: v6e
topology: v6e:2x2x1
jax: 0.10.0
libtpu: 0.0.40
codegen_flags: <defaults>
</compile_context>

<pallas_src>
import functools

import jax
import jax.numpy as jnp
from jax.experimental import pallas as pl
from jax.experimental.pallas import tpu as pltpu

_LANE = 128     # vreg lane width
_SUBLANE = 8    # f32 sublane count


def _encoder_kernel(x_ref, w1_ref, b1_ref, w2_ref, b2_ref, out_ref):
    # Hot path: two stacked GEMMs (second one is the fused mu||logvar head),
    # bias + ReLU on the VPU in between.
    x = x_ref[...]                                            # (TB, D_in)
    h = jnp.dot(x, w1_ref[...], preferred_element_type=jnp.float32)
    h = jnp.maximum(h + b1_ref[...], 0.0)                     # bias + ReLU

    out = jnp.dot(h, w2_ref[...], preferred_element_type=jnp.float32)  # (TB, 2Z)
    out_ref[...] = (out + b2_ref[...]).astype(out_ref.dtype)


def prepare_params(params):
    """One-time glue (NOT in the hot path).  Returns a dict of ARRAYS ONLY
    (jit-friendly pytree):
      * transpose weights to (in, out) layout,
      * fuse the mu/logvar heads: W21 || W22 -> (H, 2Z), b21 || b22 -> (1, 2Z),
      * zero-pad the hidden dim up to a 128-lane multiple (lane-dense h,
        friendlier MXU K for the second GEMM).  The OUTPUT dim is NOT padded
        (keeps HBM writeback minimal)."""
    w1 = params["w1"].T.astype(jnp.float32)                   # (D_in, H)
    b1 = params["b1"].reshape(1, -1).astype(jnp.float32)      # (1, H)

    w2 = jnp.concatenate([params["w21"].T, params["w22"].T], axis=1)  # (H, 2Z)
    b2 = jnp.concatenate([params["b21"], params["b22"]]).reshape(1, -1)

    h_dim = w1.shape[1]
    h_pad = max(_LANE, pl.cdiv(h_dim, _LANE) * _LANE)
    if h_pad != h_dim:
        w1 = jnp.pad(w1, ((0, 0), (0, h_pad - h_dim)))        # (D_in, H_pad)
        b1 = jnp.pad(b1, ((0, 0), (0, h_pad - h_dim)))        # (1, H_pad)
        w2 = jnp.pad(w2, ((0, h_pad - h_dim), (0, 0)))        # (H_pad, 2Z)

    return {
        "w1": w1.astype(jnp.float32),
        "b1": b1.astype(jnp.float32),
        "w2": w2.astype(jnp.float32),
        "b2": b2.astype(jnp.float32),
    }


@functools.partial(jax.jit, static_argnames=("max_batch_tile",))
def encoder_forward(x, prep, *, max_batch_tile=2048):
    """x: (B, input_dim) float32.  prep: output of prepare_params (arrays only)."""
    B, D_in = x.shape
    w1, b1, w2, b2 = prep["w1"], prep["b1"], prep["w2"], prep["b2"]
    n_out = w2.shape[1]                  # 2Z (static at trace time)
    z_dim = n_out // 2                   # static at trace time

    # Tight batch padding: only up to a sublane multiple, then split into the
    # minimum number of tiles (>=2 when possible so v7x uses both TensorCores).
    b_pad = pl.cdiv(B, _SUBLANE) * _SUBLANE
    num_tiles = pl.cdiv(b_pad, max_batch_tile)
    if num_tiles == 1 and b_pad >= 2 * _SUBLANE:
        num_tiles = 2
    tb = pl.cdiv(pl.cdiv(b_pad, num_tiles), _SUBLANE) * _SUBLANE
    b_final = tb * num_tiles
    if b_final != B:
        x = jnp.pad(x, ((0, b_final - B), (0, 0)))

    # Weights/biases: same (0, 0) block every grid step -> stay resident in VMEM.
    resident = lambda shape: pl.BlockSpec(shape, lambda i: (0,) * len(shape))

    out = pl.pallas_call(
        _encoder_kernel,
        out_shape=jax.ShapeDtypeStruct((b_final, n_out), jnp.float32),
        grid_spec=pltpu.PrefetchScalarGridSpec(
            num_scalar_prefetch=0,
            grid=(num_tiles,),
            in_specs=[
                pl.BlockSpec((tb, D_in), lambda i: (i, 0)),   # x: batch-tiled
                resident(w1.shape),                           # (D_in, H_pad)
                resident(b1.shape),                           # (1, H_pad)
                resident(w2.shape),                           # (H_pad, 2Z)
                resident(b2.shape),                           # (1, 2Z)
            ],
            out_specs=pl.BlockSpec((tb, n_out), lambda i: (i, 0)),
        ),
        compiler_params=pltpu.CompilerParams(
            # Batch axis is embarrassingly parallel -> megacore sharding on v7x.
            dimension_semantics=("parallel",),
        ),
    )(x, w1, b1, w2, b2)

    mu = out[:B, :z_dim]
    logvar = out[:B, z_dim:n_out]
    return mu, logvar


def init_params(key, input_dim, hidden_dim, z_dim):
    """Deterministic init mimicking nn.Linear default (U(-1/sqrt(fan_in), +))."""
    def linear(k, out_f, in_f):
        kw, kb = jax.random.split(k)
        bound = 1.0 / jnp.sqrt(in_f)
        w = jax.random.uniform(kw, (out_f, in_f), jnp.float32, -bound, bound)
        b = jax.random.uniform(kb, (out_f,), jnp.float32, -bound, bound)
        return w, b

    k1, k2, k3 = jax.random.split(key, 3)
    w1, b1 = linear(k1, hidden_dim, input_dim)
    w21, b21 = linear(k2, z_dim, hidden_dim)
    w22, b22 = linear(k3, z_dim, hidden_dim)
    return {"w1": w1, "b1": b1, "w21": w21, "b21": b21, "w22": w22, "b22": b22}


def _reference(x, p):
    h = jax.nn.relu(x @ p["w1"].T + p["b1"])
    return h @ p["w21"].T + p["b21"], h @ p["w22"].T + p["b22"]


if __name__ == "__main__":
    INPUT_DIM, HIDDEN_DIM, Z_DIM = 32, 64, 16

    key = jax.random.PRNGKey(0)
    kx, kx2, kp = jax.random.split(key, 3)
    params = init_params(kp, INPUT_DIM, HIDDEN_DIM, Z_DIM)
    prep = prepare_params(params)                      # one-time, outside hot path

    # Case 1: sublane-aligned batch.
    x = jax.random.normal(kx, (8, INPUT_DIM), jnp.float32)
    mu, logvar = encoder_forward(x, prep)
    jax.block_until_ready((mu, logvar))
    mu_ref, logvar_ref = _reference(x, params)
    assert mu.shape == (8, Z_DIM) and logvar.shape == (8, Z_DIM)
    assert jnp.allclose(mu, mu_ref, atol=1e-5), "mu mismatch vs reference"
    assert jnp.allclose(logvar, logvar_ref, atol=1e-5), "logvar mismatch vs reference"

    # Case 2: ragged batch (exercises the sublane-padding path).
    x2 = jax.random.normal(kx2, (5, INPUT_DIM), jnp.float32)
    mu2, logvar2 = encoder_forward(x2, prep)
    jax.block_until_ready((mu2, logvar2))
    mu2_ref, logvar2_ref = _reference(x2, params)
    assert mu2.shape == (5, Z_DIM) and logvar2.shape == (5, Z_DIM)
    assert jnp.allclose(mu2, mu2_ref, atol=1e-5), "mu mismatch vs reference (ragged B)"
    assert jnp.allclose(logvar2, logvar2_ref, atol=1e-5), "logvar mismatch vs reference (ragged B)"

    # Case 3: larger batch that uses >= 2 grid steps (v7x dual-TC path).
    x3 = jax.random.normal(kx, (40, INPUT_DIM), jnp.float32)
    mu3, logvar3 = encoder_forward(x3, prep)
    jax.block_until_ready((mu3, logvar3))
    mu3_ref, logvar3_ref = _reference(x3, params)
    assert jnp.allclose(mu3, mu3_ref, atol=1e-5), "mu mismatch vs reference (multi-tile)"
    assert jnp.allclose(logvar3, logvar3_ref, atol=1e-5), "logvar mismatch vs reference (multi-tile)"

    print("KERNEL_OK")
</pallas_src>

<mosaic_0001>
module attributes {stable_mosaic.version = 11 : i64} {
  func.func @_encoder_kernel(%arg0: i32, %arg1: memref<8x32xf32, #tpu.memory_space<vmem>>, %arg2: memref<32x128xf32, #tpu.memory_space<vmem>>, %arg3: memref<1x128xf32, #tpu.memory_space<vmem>>, %arg4: memref<128x32xf32, #tpu.memory_space<vmem>>, %arg5: memref<1x32xf32, #tpu.memory_space<vmem>>, %arg6: memref<8x32xf32, #tpu.memory_space<vmem>>) attributes {dimension_semantics = [#tpu.dimension_semantics<parallel>], iteration_bounds = array<i64: 1>, scalar_prefetch = 0 : i64, scratch_operands = 0 : i64, tpu.core_type = #tpu.core_type<tc>, window_params = [{transform_indices = @transform_0, window_bounds = array<i64: 8, 32>}, {pipeline_mode = #tpu.pipeline_mode<synchronous>, transform_indices = @transform_1, window_bounds = array<i64: 32, 128>}, {pipeline_mode = #tpu.pipeline_mode<synchronous>, transform_indices = @transform_2, window_bounds = array<i64: 1, 128>}, {pipeline_mode = #tpu.pipeline_mode<synchronous>, transform_indices = @transform_3, window_bounds = array<i64: 128, 32>}, {pipeline_mode = #tpu.pipeline_mode<synchronous>, transform_indices = @transform_4, window_bounds = array<i64: 1, 32>}, {transform_indices = @transform_5, window_bounds = array<i64: 8, 32>}]} {
    %c0 = arith.constant 0 : index
    %c0_0 = arith.constant 0 : index
    %0 = vector.load %arg1[%c0, %c0_0] : memref<8x32xf32, #tpu.memory_space<vmem>>, vector<8x32xf32>
    %c0_1 = arith.constant 0 : index
    %c0_2 = arith.constant 0 : index
    %1 = vector.load %arg2[%c0_1, %c0_2] : memref<32x128xf32, #tpu.memory_space<vmem>>, vector<32x128xf32>
    %cst = arith.constant dense<0.000000e+00> : vector<8x128xf32>
    %2 = tpu.matmul %0, %1, %cst {dimension_numbers = #tpu.dot_dimension_numbers<[1], [0], [0], [1], [0, 0, 1, 1], [], []>} : vector<8x32xf32>, vector<32x128xf32>, vector<8x128xf32> -> vector<8x128xf32>
    %c0_3 = arith.constant 0 : index
    %c0_4 = arith.constant 0 : index
    %3 = vector.load %arg3[%c0_3, %c0_4] : memref<1x128xf32, #tpu.memory_space<vmem>>, vector<1x128xf32>
    %4 = vector.broadcast %3 : vector<1x128xf32> to vector<8x128xf32>
    %5 = arith.addf %2, %4 : vector<8x128xf32>
    %cst_5 = arith.constant 0.000000e+00 : f32
    %6 = vector.broadcast %cst_5 : f32 to vector<8x128xf32>
    %7 = arith.maximumf %5, %6 : vector<8x128xf32>
    %c0_6 = arith.constant 0 : index
    %c0_7 = arith.constant 0 : index
    %8 = vector.load %arg4[%c0_6, %c0_7] : memref<128x32xf32, #tpu.memory_space<vmem>>, vector<128x32xf32>
    %cst_8 = arith.constant dense<0.000000e+00> : vector<8x32xf32>
    %9 = tpu.matmul %7, %8, %cst_8 {dimension_numbers = #tpu.dot_dimension_numbers<[1], [0], [0], [1], [0, 0, 1, 1], [], []>} : vector<8x128xf32>, vector<128x32xf32>, vector<8x32xf32> -> vector<8x32xf32>
    %c0_9 = arith.constant 0 : index
    %c0_10 = arith.constant 0 : index
    %10 = vector.load %arg5[%c0_9, %c0_10] : memref<1x32xf32, #tpu.memory_space<vmem>>, vector<1x32xf32>
    %11 = vector.broadcast %10 : vector<1x32xf32> to vector<8x32xf32>
    %12 = arith.addf %9, %11 : vector<8x32xf32>
    %c0_11 = arith.constant 0 : index
    %c0_12 = arith.constant 0 : index
    %13 = vector.load %arg6[%c0_11, %c0_12] : memref<8x32xf32, #tpu.memory_space<vmem>>, vector<8x32xf32>
    tpu.vector_store %arg6[%c0_11, %c0_12], %12 {strides = array<i32>} : memref<8x32xf32, #tpu.memory_space<vmem>>, vector<8x32xf32>,
    return
  }
  func.func @transform_0(%arg0: i32) -> (i32, i32) {
    %c0_i32 = arith.constant 0 : i32
    %c0_i32_0 = arith.constant 0 : i32
    return %arg0, %c0_i32 : i32, i32
  }
  func.func @transform_1(%arg0: i32) -> (i32, i32) {
    %c0_i32 = arith.constant 0 : i32
    %c0_i32_0 = arith.constant 0 : i32
    %c0_i32_1 = arith.constant 0 : i32
    return %c0_i32, %c0_i32_0 : i32, i32
  }
  func.func @transform_2(%arg0: i32) -> (i32, i32) {
    %c0_i32 = arith.constant 0 : i32
    %c0_i32_0 = arith.constant 0 : i32
    %c0_i32_1 = arith.constant 0 : i32
    return %c0_i32, %c0_i32_0 : i32, i32
  }
  func.func @transform_3(%arg0: i32) -> (i32, i32) {
    %c0_i32 = arith.constant 0 : i32
    %c0_i32_0 = arith.constant 0 : i32
    %c0_i32_1 = arith.constant 0 : i32
    return %c0_i32, %c0_i32_0 : i32, i32
  }
  func.func @transform_4(%arg0: i32) -> (i32, i32) {
    %c0_i32 = arith.constant 0 : i32
    %c0_i32_0 = arith.constant 0 : i32
    %c0_i32_1 = arith.constant 0 : i32
    return %c0_i32, %c0_i32_0 : i32, i32
  }
  func.func @transform_5(%arg0: i32) -> (i32, i32) {
    %c0_i32 = arith.constant 0 : i32
    %c0_i32_0 = arith.constant 0 : i32
    return %arg0, %c0_i32 : i32, i32
  }
}

</mosaic_0001>

<bundles_post_ra>
// kernel: encoder_forward.1
= control target key start
LH: loop header
LB: loop body
LE: loop exit
PB: predicated region body
PF: predicated region fallthrough
CT: control target
= control target key end

     0   :  { %v278_v0 = vmov 0.0   ;;  %vm279_vm0 = vmmov 0   ;;  %vm32_vm1 = vcmask 261120   ;;  %s408_s1 = inlined_call_operand.vmem [shape: f32[32,128], index: 1, kind: input, shape index: {}]   ;;  %s409_s3 = inlined_call_operand.vmem [shape: f32[128,32], index: 3, kind: input, shape index: {}]   ;;  %s410_s0 = inlined_call_operand.vmem [shape: f32[8,32], index: 0, kind: input, shape index: {}]   ;;  %s411_s2 = inlined_call_operand.vmem [shape: f32[1,128], index: 2, kind: input, shape index: {}]   ;;  %s412_s4 = inlined_call_operand.vmem [shape: f32[1,32], index: 4, kind: input, shape index: {}]   ;;  %s413_s5 = inlined_call_operand.vmem [shape: f32[8,32], index: 5, kind: output, shape index: {}]  }
   0x1   :  { %230 = vmatprep.subr.mxu0 %v278_v0  ;;  %v24_v1 = vld [vmem:[%s408_s1 + $0x18] sm:$0xff]  ;;  %v23_v2 = vld [vmem:[%s408_s1 + $0x10] sm:$0xff]  ;;  %238 = vmatprep.mubr.msk.f32.mxu0 %vm279_vm0, %v278_v0  ;;  %v22_v4 = vld [vmem:[%s408_s1 + $0x8] sm:$0xff] }
   0x2   :  { %231 = vmatpush3.msra.mxu0 %v24_v1  ;;  %241 = vmatprep.subr.mxu1 %v278_v0  ;;  %v122_v3 = vld [vmem:[%s409_s3 + $0x78] sm:$0xff]  ;;  %v121_v5 = vld [vmem:[%s409_s3 + $0x70] sm:$0xff]  ;;  %v120_v6 = vld [vmem:[%s409_s3 + $0x68] sm:$0xff] }
   0x3   :  { %232 = vmatprep.subr.mxu0 %v278_v0  ;;  %242 = vmatpush3.msra.mxu1 %v122_v3  ;;  %v21_v7 = vld [vmem:[%s408_s1] sm:$0xff]  ;;  %v118_v10 = vld [vmem:[%s409_s3 + $0x58] sm:$0xff]  ;;  %v117_v11 = vld [vmem:[%s409_s3 + $0x50] sm:$0xff] }
   0x4   :  { %233 = vmatpush3.msra.mxu0 %v23_v2  ;;  %243 = vmatprep.subr.mxu1 %v278_v0  ;;  %v20_v8 = vld [vmem:[%s410_s0] sm:$0xff]  ;;  %v116_v12 = vld [vmem:[%s409_s3 + $0x48] sm:$0xff]  ;;  %v114_v14 = vld [vmem:[%s409_s3 + $0x38] sm:$0xff] }
   0x5   :  { %234 = vmatprep.subr.mxu0 %v278_v0  ;;  %244 = vmatpush3.msra.mxu1 %v121_v5  ;;  %v119_v9 = vld [vmem:[%s409_s3 + $0x60] sm:$0xff]  ;;  %v113_v15 = vld [vmem:[%s409_s3 + $0x30] sm:$0xff]  ;;  %v112_v16 = vld [vmem:[%s409_s3 + $0x28] sm:$0xff] }
   0x6   :  { %235 = vmatpush3.msra.mxu0 %v22_v4  ;;  %245 = vmatprep.subr.mxu1 %v278_v0  ;;  %v115_v13 = vld [vmem:[%s409_s3 + $0x40] sm:$0xff]  ;;  %v110_v18 = vld [vmem:[%s409_s3 + $0x18] sm:$0xff]  ;;  %v109_v19 = vld [vmem:[%s409_s3 + $0x10] sm:$0xff] }
   0x7   :  { %236 = vmatprep.subr.mxu0 %v278_v0  ;;  %246 = vmatpush3.msra.mxu1 %v120_v6  ;;  %v111_v17 = vld [vmem:[%s409_s3 + $0x20] sm:$0xff]  ;;  %v108_v20 = vld [vmem:[%s409_s3 + $0x8] sm:$0xff] }
   0x8   :  { %237 = vmatpush3.msra.mxu0 %v21_v7  ;;  %247 = vmatprep.subr.mxu1 %v278_v0  ;;  %v107_v21 = vld [vmem:[%s409_s3] sm:$0xff] }
   0x9   :  { %239 = vmatmul.mubr.msk.f32.vlgmr.msra.gmra.mxu0 %vm32_vm1, %v20_v8  ;;  %248 = vmatpush3.msra.mxu1 %v119_v9  ;;  %v205_v22 = vld [vmem:[%s411_s2] ss:$0 sm:$0xff] }
   0xa   :  { %249 = vmatprep.subr.mxu1 %v278_v0  ;;  %273 = vmatprep.mubr.msk.f32.mxu1 %vm279_vm0, %v278_v0  ;;  %v207_v27 = vld [vmem:[%s412_s4] ss:$0 sm:$0xff] }
   0xb   :  { %250 = vmatpush3.msra.mxu1 %v118_v10 }
   0xc   :  { %251 = vmatprep.subr.mxu1 %v278_v0 }
   0xd   :  { %252 = vmatpush3.msra.mxu1 %v117_v11 }
   0xe   :  { %253 = vmatprep.subr.mxu1 %v278_v0 }
   0xf   :  { %254 = vmatpush3.msra.mxu1 %v116_v12 }
  0x10   :  { %255 = vmatprep.subr.mxu1 %v278_v0 }
  0x11   :  { %256 = vmatpush3.msra.mxu1 %v115_v13 }
  0x12   :  { %257 = vmatprep.subr.mxu1 %v278_v0 }
  0x13   :  { %258 = vmatpush3.msra.mxu1 %v114_v14 }
  0x14   :  { %259 = vmatprep.subr.mxu1 %v278_v0 }
  0x15   :  { %260 = vmatpush3.msra.mxu1 %v113_v15 }
  0x16   :  { %261 = vmatprep.subr.mxu1 %v278_v0 }
  0x17   :  { %262 = vmatpush3.msra.mxu1 %v112_v16 }
  0x18   :  { %263 = vmatprep.subr.mxu1 %v278_v0 }
  0x19   :  { %264 = vmatpush3.msra.mxu1 %v111_v17 }
  0x1a   :  { %265 = vmatprep.subr.mxu1 %v278_v0 }
  0x1b   :  { %266 = vmatpush3.msra.mxu1 %v110_v18 }
  0x1c   :  { %267 = vmatprep.subr.mxu1 %v278_v0 }
  0x1d   :  { %268 = vmatpush3.msra.mxu1 %v109_v19 }
  0x1e   :  { %269 = vmatprep.subr.mxu1 %v278_v0 }
  0x1f   :  { %270 = vmatpush3.msra.mxu1 %v108_v20 }
  0x20   :  { %271 = vmatprep.subr.mxu1 %v278_v0 }
  0x21   :  { %272 = vmatpush3.msra.mxu1 %v107_v21 }
  0xc9   :  { %v102_v23 = vpop.f32.mrf.mxu0 }
  0xca   :  { %v103_v24 = vadd.f32 %v205_v22, %v102_v23 }
  0xcb   :  { %v240_v25 = vpop.f32.mrf.mxu0 }
  0xcc   :  { %v106_v26 = vmax.f32 %v103_v24, 0.0 }
  0xce   :  { %274 = vmatmul.mubr.f32.vlgmr.msra.gmra.mxu1 %v106_v26 }
 0x18e   :  { %v196_v28 = vpop.f32.mrf.mxu1 }
 0x18f   :  { %v197_v29 = vadd.f32 %v207_v27, %v196_v28 }
 0x190   :  { %v275_v30 = vpop.f32.mrf.mxu1 }
 0x191   :  { %200 = vst.msk [vmem:[%s413_s5] sm:$0xff] %vm32_vm1, %v197_v29 }

</bundles_post_ra>
